<compile_context>
chip_gen: v7x
topology: tpu7x:2x2x1
jax: 0.10.0
libtpu: 0.0.40
codegen_flags: <defaults>
</compile_context>

<pallas_src>
import math

import jax
import jax.numpy as jnp
from jax.experimental import pallas as pl
from jax.experimental.pallas import tpu as pltpu

D_MODEL = 256        # Conv2d(64, 256) and PositionalEncoding(d_model=256)
H1 = 32
H2 = 64
POOL = 10            # max_pool2d kernel_size=(1, 10)

TARGET_ROWS = 4096   # points per grid step; sized to stay well inside v7x's 64 MiB VMEM


# ---------------------------------------------------------------------------
# Pallas kernel: T polylines (T*N_p points) per grid step.
# ---------------------------------------------------------------------------
def _encoder_kernel(x_ref, w1_ref, b1_ref, w2_ref, b2_ref, w3_ref, pe_ref, enc_ref):
    # x_ref:  (ROWS, map_dim) bf16, ROWS = T*N_p, rows ordered (p, t, g)
    # pe_ref: (ROWS, D_MODEL) f32, positional encoding + conv bias, same row order
    # enc_ref:(T*G, D_MODEL)  f32, pooled encodings, rows ordered (t, g)
    x = x_ref[...]

    # point_net: Linear(map_dim, 32) -> ReLU -> Linear(32, 64)  (bf16 MXU, f32 acc)
    h1 = jnp.dot(x, w1_ref[...], preferred_element_type=jnp.float32)
    h1 = jnp.maximum(h1 + b1_ref[...], 0.0)
    h2 = jnp.dot(h1.astype(jnp.bfloat16), w2_ref[...],
                 preferred_element_type=jnp.float32) + b2_ref[...]
    # 1x1 Conv2d(64, 256) == per-point Linear(64, 256); its bias is folded into pe_ref.
    h3 = jnp.dot(h2.astype(jnp.bfloat16), w3_ref[...],
                 preferred_element_type=jnp.float32) + pe_ref[...]

    # Segment max-pool over the 10 point offsets: rows were permuted so that offset p
    # is the contiguous slice [p*TG, (p+1)*TG) -> pure VPU maximums on aligned tiles.
    tg = enc_ref.shape[0]
    pooled = h3[0:tg]
    for p in range(1, POOL):
        pooled = jnp.maximum(pooled, h3[p * tg:(p + 1) * tg])
    enc_ref[...] = pooled


# ---------------------------------------------------------------------------
# Parameter / buffer construction (deterministic, synthetic weights)
# ---------------------------------------------------------------------------
def make_params(key, map_dim):
    ks = jax.random.split(key, 6)

    def uinit(k, shape, fan_in):
        bound = 1.0 / math.sqrt(fan_in)
        return jax.random.uniform(k, shape, jnp.float32, -bound, bound)

    w1 = uinit(ks[0], (map_dim, H1), map_dim)
    b1 = uinit(ks[1], (1, H1), map_dim)
    w2 = uinit(ks[2], (H1, H2), H1)
    b2 = uinit(ks[3], (1, H2), H1)
    # conv weight in torch: (256, 64, 1, 1); equivalent linear weight is its transpose
    w3 = uinit(ks[4], (H2, D_MODEL), H2)
    b3 = uinit(ks[5], (1, D_MODEL), H2)
    return dict(w1=w1, b1=b1, w2=w2, b2=b2, w3=w3, b3=b3)


def make_positional_encoding(max_len, d_model=D_MODEL):
    position = jnp.arange(max_len, dtype=jnp.float32)[:, None]            # (L, 1)
    div_term = jnp.exp(jnp.arange(0, d_model, 2, dtype=jnp.float32)
                       * (-math.log(10000.0) / d_model))                  # (d/2,)
    pe = jnp.zeros((max_len, d_model), jnp.float32)
    pe = pe.at[:, 0::2].set(jnp.sin(position * div_term))
    pe = pe.at[:, 1::2].set(jnp.cos(position * div_term))
    return pe                                                             # (L, 256)


# ---------------------------------------------------------------------------
# Tiling helpers
# ---------------------------------------------------------------------------
def _round_up(a, b):
    return (a + b - 1) // b * b


def _choose_polylines_per_step(bn, n_p, g):
    # Sublane alignment: blocks are (T*n_p, map_dim) and (T*g, 256); both leading
    # dims must be multiples of 8 when there is more than one grid step.
    a1 = 8 // math.gcd(8, n_p)
    a2 = 8 // math.gcd(8, g)
    align = a1 * a2 // math.gcd(a1, a2)
    t_cap = max(align, (TARGET_ROWS // n_p) // align * align)   # big, VMEM-safe tile
    if bn > align:
        # Prefer >= 2 grid steps so both v7x TensorCores get work.
        t_two = _round_up(-(-bn // 2), align)
        return max(align, min(t_cap, t_two))
    return align


# ---------------------------------------------------------------------------
# Wrapper
# ---------------------------------------------------------------------------
@jax.jit
def vector_map_encoder(x, params, pe):
    B, N_e, N_p, map_dim = x.shape
    assert N_p % POOL == 0, "map_len must be a multiple of 10"
    G = N_p // POOL
    BN = B * N_e

    T = _choose_polylines_per_step(BN, N_p, G)
    BN_pad = _round_up(BN, T)
    S = BN_pad // T            # grid steps
    ROWS = T * N_p             # points per grid step
    TG = T * G                 # pooled rows per grid step

    x_flat = x.reshape(BN, N_p, map_dim)
    if BN_pad != BN:
        pad = jnp.zeros((BN_pad - BN, N_p, map_dim), x.dtype)
        x_flat = jnp.concatenate([x_flat, pad], axis=0)

    # Row permutation: (S, T, G, POOL, D) -> (S, POOL, T, G, D) so that each pooling
    # offset p is a contiguous, 8-sublane-aligned chunk inside a grid step's slab.
    x_perm = (x_flat.reshape(S, T, G, POOL, map_dim)
                    .transpose(0, 3, 1, 2, 4)
                    .reshape(S * ROWS, map_dim)
                    .astype(jnp.bfloat16))

    # Positional encoding with the conv bias folded in, laid out to match x_perm rows.
    pe_b3 = pe + params["b3"]                                   # (N_p, 256) f32
    pe_perm = jnp.broadcast_to(
        pe_b3.reshape(G, POOL, D_MODEL).transpose(1, 0, 2)[:, None, :, :],
        (POOL, T, G, D_MODEL)).reshape(ROWS, D_MODEL)

    w1 = params["w1"].astype(jnp.bfloat16)
    w2 = params["w2"].astype(jnp.bfloat16)
    w3 = params["w3"].astype(jnp.bfloat16)

    enc2d = pl.pallas_call(
        _encoder_kernel,
        out_shape=jax.ShapeDtypeStruct((BN_pad * G, D_MODEL), jnp.float32),
        grid=(S,),
        in_specs=[
            pl.BlockSpec((ROWS, map_dim), lambda i: (i, 0)),     # x slab (per step)
            pl.BlockSpec((map_dim, H1),   lambda i: (0, 0)),     # w1 (resident)
            pl.BlockSpec((1, H1),         lambda i: (0, 0)),     # b1
            pl.BlockSpec((H1, H2),        lambda i: (0, 0)),     # w2
            pl.BlockSpec((1, H2),         lambda i: (0, 0)),     # b2
            pl.BlockSpec((H2, D_MODEL),   lambda i: (0, 0)),     # w3 (1x1 conv)
            pl.BlockSpec((ROWS, D_MODEL), lambda i: (0, 0)),     # pe + b3 (resident)
        ],
        out_specs=pl.BlockSpec((TG, D_MODEL), lambda i: (i, 0)),  # lane-dense output
        compiler_params=pltpu.CompilerParams(
            dimension_semantics=("parallel",),
            vmem_limit_bytes=48 * 1024 * 1024),
    )(x_perm, w1, params["b1"], w2, params["b2"], w3, pe_perm)

    encoding = enc2d.reshape(BN_pad, G, D_MODEL)[:BN].reshape(B, N_e * G, D_MODEL)

    # Padding mask: "any point in the 10-point segment whose first feature == 0".
    # Exact compare + reduce on the original f32 input, done with plain XLA (per
    # the performance review, keeps a 1-lane-wide store out of the kernel).
    map_mask = jnp.max((x[..., 0] == 0.0).reshape(B, N_e, G, POOL), axis=-1)
    map_mask = map_mask.reshape(B, N_e * G)
    return encoding, map_mask


# ---------------------------------------------------------------------------
# Pure-JAX reference (mirrors the PyTorch forward, eval mode) for verification
# ---------------------------------------------------------------------------
def reference(x, params, pe):
    B, N_e, N_p, _ = x.shape
    G = N_p // POOL
    h1 = jnp.maximum(x @ params["w1"] + params["b1"][0], 0.0)
    h2 = h1 @ params["w2"] + params["b2"][0]
    h3 = h2 @ params["w3"] + params["b3"][0]
    h3 = h3 + pe[None, None, :, :]                              # (B,N_e,N_p,256)
    enc = jnp.max(h3.reshape(B, N_e, G, POOL, D_MODEL), axis=3).reshape(B, -1, D_MODEL)
    msk = (x[..., 0] == 0.0).reshape(B, N_e, G, POOL)
    msk = jnp.max(msk, axis=-1).reshape(B, -1)
    return enc, msk


if __name__ == "__main__":
    B, N_e, N_p, map_dim = 2, 4, 20, 8   # map_len = N_p = 20 (multiple of 10)

    key = jax.random.PRNGKey(0)
    k_x, k_p = jax.random.split(key)
    x = jax.random.normal(k_x, (B, N_e, N_p, map_dim), jnp.float32)
    # zero-out some trailing points so the mask has both True and False entries
    x = x.at[:, 1, 10:, :].set(0.0)
    x = x.at[0, 3, :, :].set(0.0)

    params = make_params(k_p, map_dim)
    pe = make_positional_encoding(N_p)    # PositionalEncoding(max_len=map_len)
    # TODO(synk): dropout(p=0.1) is stochastic at train time; implemented as eval-mode identity.

    enc, mask = vector_map_encoder(x, params, pe)
    jax.block_until_ready(enc)
    jax.block_until_ready(mask)

    enc_ref, mask_ref = reference(x, params, pe)
    assert enc.shape == (B, N_e * (N_p // POOL), D_MODEL)
    assert mask.shape == (B, N_e * (N_p // POOL))
    assert jnp.allclose(enc, enc_ref, rtol=2e-2, atol=2e-2), \
        float(jnp.max(jnp.abs(enc - enc_ref)))
    assert bool(jnp.all(mask == mask_ref))

    print("KERNEL_OK")
</pallas_src>

<mosaic_0001>
module attributes {stable_mosaic.version = 11 : i64} {
  func.func @_encoder_kernel(%arg0: i32, %arg1: memref<80x8xbf16, #tpu.memory_space<vmem>>, %arg2: memref<8x32xbf16, #tpu.memory_space<vmem>>, %arg3: memref<1x32xf32, #tpu.memory_space<vmem>>, %arg4: memref<32x64xbf16, #tpu.memory_space<vmem>>, %arg5: memref<1x64xf32, #tpu.memory_space<vmem>>, %arg6: memref<64x256xbf16, #tpu.memory_space<vmem>>, %arg7: memref<80x256xf32, #tpu.memory_space<vmem>>, %arg8: memref<8x256xf32, #tpu.memory_space<vmem>>) attributes {dimension_semantics = [#tpu.dimension_semantics<parallel>], iteration_bounds = array<i64: 2>, scalar_prefetch = 0 : i64, scratch_operands = 0 : i64, tpu.core_type = #tpu.core_type<tc>, window_params = [{transform_indices = @transform_0, window_bounds = array<i64: 80, 8>}, {pipeline_mode = #tpu.pipeline_mode<synchronous>, transform_indices = @transform_1, window_bounds = array<i64: 8, 32>}, {pipeline_mode = #tpu.pipeline_mode<synchronous>, transform_indices = @transform_2, window_bounds = array<i64: 1, 32>}, {pipeline_mode = #tpu.pipeline_mode<synchronous>, transform_indices = @transform_3, window_bounds = array<i64: 32, 64>}, {pipeline_mode = #tpu.pipeline_mode<synchronous>, transform_indices = @transform_4, window_bounds = array<i64: 1, 64>}, {pipeline_mode = #tpu.pipeline_mode<synchronous>, transform_indices = @transform_5, window_bounds = array<i64: 64, 256>}, {pipeline_mode = #tpu.pipeline_mode<synchronous>, transform_indices = @transform_6, window_bounds = array<i64: 80, 256>}, {transform_indices = @transform_7, window_bounds = array<i64: 8, 256>}]} {
    %c0 = arith.constant 0 : index
    %c0_0 = arith.constant 0 : index
    %0 = vector.load %arg1[%c0, %c0_0] : memref<80x8xbf16, #tpu.memory_space<vmem>>, vector<80x8xbf16>
    %c0_1 = arith.constant 0 : index
    %c0_2 = arith.constant 0 : index
    %1 = vector.load %arg2[%c0_1, %c0_2] : memref<8x32xbf16, #tpu.memory_space<vmem>>, vector<8x32xbf16>
    %cst = arith.constant dense<0.000000e+00> : vector<80x32xf32>
    %2 = tpu.matmul %0, %1, %cst {dimension_numbers = #tpu.dot_dimension_numbers<[1], [0], [0], [1], [0, 0, 1, 1], [], []>} : vector<80x8xbf16>, vector<8x32xbf16>, vector<80x32xf32> -> vector<80x32xf32>
    %c0_3 = arith.constant 0 : index
    %c0_4 = arith.constant 0 : index
    %3 = vector.load %arg3[%c0_3, %c0_4] : memref<1x32xf32, #tpu.memory_space<vmem>>, vector<1x32xf32>
    %4 = vector.broadcast %3 : vector<1x32xf32> to vector<80x32xf32>
    %5 = arith.addf %2, %4 : vector<80x32xf32>
    %cst_5 = arith.constant 0.000000e+00 : f32
    %6 = vector.broadcast %cst_5 : f32 to vector<80x32xf32>
    %7 = arith.maximumf %5, %6 : vector<80x32xf32>
    %8 = arith.truncf %7 : vector<80x32xf32> to vector<80x32xbf16>
    %c0_6 = arith.constant 0 : index
    %c0_7 = arith.constant 0 : index
    %9 = vector.load %arg4[%c0_6, %c0_7] : memref<32x64xbf16, #tpu.memory_space<vmem>>, vector<32x64xbf16>
    %cst_8 = arith.constant dense<0.000000e+00> : vector<80x64xf32>
    %10 = tpu.matmul %8, %9, %cst_8 {dimension_numbers = #tpu.dot_dimension_numbers<[1], [0], [0], [1], [0, 0, 1, 1], [], []>} : vector<80x32xbf16>, vector<32x64xbf16>, vector<80x64xf32> -> vector<80x64xf32>
    %c0_9 = arith.constant 0 : index
    %c0_10 = arith.constant 0 : index
    %11 = vector.load %arg5[%c0_9, %c0_10] : memref<1x64xf32, #tpu.memory_space<vmem>>, vector<1x64xf32>
    %12 = vector.broadcast %11 : vector<1x64xf32> to vector<80x64xf32>
    %13 = arith.addf %10, %12 : vector<80x64xf32>
    %14 = arith.truncf %13 : vector<80x64xf32> to vector<80x64xbf16>
    %c0_11 = arith.constant 0 : index
    %c0_12 = arith.constant 0 : index
    %15 = vector.load %arg6[%c0_11, %c0_12] : memref<64x256xbf16, #tpu.memory_space<vmem>>, vector<64x256xbf16>
    %cst_13 = arith.constant dense<0.000000e+00> : vector<80x256xf32>
    %16 = tpu.matmul %14, %15, %cst_13 {dimension_numbers = #tpu.dot_dimension_numbers<[1], [0], [0], [1], [0, 0, 1, 1], [], []>} : vector<80x64xbf16>, vector<64x256xbf16>, vector<80x256xf32> -> vector<80x256xf32>
    %c0_14 = arith.constant 0 : index
    %c0_15 = arith.constant 0 : index
    %17 = vector.load %arg7[%c0_14, %c0_15] : memref<80x256xf32, #tpu.memory_space<vmem>>, vector<80x256xf32>
    %18 = arith.addf %16, %17 : vector<80x256xf32>
    %19 = vector.extract_strided_slice %18 {offsets = [0, 0], sizes = [8, 256], strides = [1, 1]} : vector<80x256xf32> to vector<8x256xf32>
    %20 = vector.extract_strided_slice %18 {offsets = [8, 0], sizes = [8, 256], strides = [1, 1]} : vector<80x256xf32> to vector<8x256xf32>
    %21 = arith.maximumf %19, %20 : vector<8x256xf32>
    %22 = vector.extract_strided_slice %18 {offsets = [16, 0], sizes = [8, 256], strides = [1, 1]} : vector<80x256xf32> to vector<8x256xf32>
    %23 = arith.maximumf %21, %22 : vector<8x256xf32>
    %24 = vector.extract_strided_slice %18 {offsets = [24, 0], sizes = [8, 256], strides = [1, 1]} : vector<80x256xf32> to vector<8x256xf32>
    %25 = arith.maximumf %23, %24 : vector<8x256xf32>
    %26 = vector.extract_strided_slice %18 {offsets = [32, 0], sizes = [8, 256], strides = [1, 1]} : vector<80x256xf32> to vector<8x256xf32>
    %27 = arith.maximumf %25, %26 : vector<8x256xf32>
    %28 = vector.extract_strided_slice %18 {offsets = [40, 0], sizes = [8, 256], strides = [1, 1]} : vector<80x256xf32> to vector<8x256xf32>
    %29 = arith.maximumf %27, %28 : vector<8x256xf32>
    %30 = vector.extract_strided_slice %18 {offsets = [48, 0], sizes = [8, 256], strides = [1, 1]} : vector<80x256xf32> to vector<8x256xf32>
    %31 = arith.maximumf %29, %30 : vector<8x256xf32>
    %32 = vector.extract_strided_slice %18 {offsets = [56, 0], sizes = [8, 256], strides = [1, 1]} : vector<80x256xf32> to vector<8x256xf32>
    %33 = arith.maximumf %31, %32 : vector<8x256xf32>
    %34 = vector.extract_strided_slice %18 {offsets = [64, 0], sizes = [8, 256], strides = [1, 1]} : vector<80x256xf32> to vector<8x256xf32>
    %35 = arith.maximumf %33, %34 : vector<8x256xf32>
    %36 = vector.extract_strided_slice %18 {offsets = [72, 0], sizes = [8, 256], strides = [1, 1]} : vector<80x256xf32> to vector<8x256xf32>
    %37 = arith.maximumf %35, %36 : vector<8x256xf32>
    %c0_16 = arith.constant 0 : index
    %c0_17 = arith.constant 0 : index
    %38 = vector.load %arg8[%c0_16, %c0_17] : memref<8x256xf32, #tpu.memory_space<vmem>>, vector<8x256xf32>
    tpu.vector_store %arg8[%c0_16, %c0_17], %37 {strides = array<i32>} : memref<8x256xf32, #tpu.memory_space<vmem>>, vector<8x256xf32>,
    return
  }
  func.func @transform_0(%arg0: i32) -> (i32, i32) {
    %c0_i32 = arith.constant 0 : i32
    %c0_i32_0 = arith.constant 0 : i32
    return %arg0, %c0_i32 : i32, i32
  }
  func.func @transform_1(%arg0: i32) -> (i32, i32) {
    %c0_i32 = arith.constant 0 : i32
    %c0_i32_0 = arith.constant 0 : i32
    %c0_i32_1 = arith.constant 0 : i32
    return %c0_i32, %c0_i32_0 : i32, i32
  }
  func.func @transform_2(%arg0: i32) -> (i32, i32) {
    %c0_i32 = arith.constant 0 : i32
    %c0_i32_0 = arith.constant 0 : i32
    %c0_i32_1 = arith.constant 0 : i32
    return %c0_i32, %c0_i32_0 : i32, i32
  }
  func.func @transform_3(%arg0: i32) -> (i32, i32) {
    %c0_i32 = arith.constant 0 : i32
    %c0_i32_0 = arith.constant 0 : i32
    %c0_i32_1 = arith.constant 0 : i32
    return %c0_i32, %c0_i32_0 : i32, i32
  }
  func.func @transform_4(%arg0: i32) -> (i32, i32) {
    %c0_i32 = arith.constant 0 : i32
    %c0_i32_0 = arith.constant 0 : i32
    %c0_i32_1 = arith.constant 0 : i32
    return %c0_i32, %c0_i32_0 : i32, i32
  }
  func.func @transform_5(%arg0: i32) -> (i32, i32) {
    %c0_i32 = arith.constant 0 : i32
    %c0_i32_0 = arith.constant 0 : i32
    %c0_i32_1 = arith.constant 0 : i32
    return %c0_i32, %c0_i32_0 : i32, i32
  }
  func.func @transform_6(%arg0: i32) -> (i32, i32) {
    %c0_i32 = arith.constant 0 : i32
    %c0_i32_0 = arith.constant 0 : i32
    %c0_i32_1 = arith.constant 0 : i32
    return %c0_i32, %c0_i32_0 : i32, i32
  }
  func.func @transform_7(%arg0: i32) -> (i32, i32) {
    %c0_i32 = arith.constant 0 : i32
    %c0_i32_0 = arith.constant 0 : i32
    return %arg0, %c0_i32 : i32, i32
  }
}

</mosaic_0001>

<bundles_post_ra>
// kernel: vector_map_encoder.1
= control target key start
LH: loop header
LB: loop body
LE: loop exit
PB: predicated region body
PF: predicated region fallthrough
CT: control target
= control target key end

     0   :  { %12 = vsyncpa [#allocation3], 0  ;;  %s1324_s0 = inlined_call_operand.vmem [shape: bf16[160,8], index: 0, kind: input, shape index: {}]   ;;  %s1325_s1 = inlined_call_operand.vmem [shape: bf16[8,32], index: 1, kind: input, shape index: {}]   ;;  %s1326_s2 = inlined_call_operand.vmem [shape: f32[1,32], index: 2, kind: input, shape index: {}]   ;;  %s1327_s3 = inlined_call_operand.vmem [shape: bf16[32,64], index: 3, kind: input, shape index: {}]   ;;  %s1328_s4 = inlined_call_operand.vmem [shape: f32[1,64], index: 4, kind: input, shape index: {}]   ;;  %s1329_s5 = inlined_call_operand.vmem [shape: bf16[64,256], index: 5, kind: input, shape index: {}]   ;;  %s1330_s6 = inlined_call_operand.vmem [shape: f32[80,256], index: 6, kind: input, shape index: {}]   ;;  %s1331_s7 = inlined_call_operand.hbm [shape: f32[16,256], index: 7, kind: output, shape index: {}]  }
   0x1   :  { %14 = vsyncpa [#allocation3 + $0x1], 0  ;;  %s1083_s24 = smov 0   ;;  %s1085_s25 = smov 0  }
   0x2   :  { %s1087_s26 = smov 0   ;;  %s1089_s27 = smov 0  }
   0x3 LB: > { %s1104_s28 = sadd.s32 4294967295, %s1037_s27   ;;  %s809_s29 = sadd.s32 4294967294, %s1037_s27   ;;  %s1037_s27 = sphi %s1089_s27, %s1337_s27   ;;  %s1033_s26 = sphi %s1087_s26, %s1336_s26   ;;  %s1029_s25 = sphi %s1085_s25, %s1335_s25   ;;  %s1025_s24 = sphi %s1083_s24, %s1334_s24  }
   0x4   : > { %s1108_s30 = sadd.s32 1, %s1037_s27   ;;  %s179_s8 = sadd.s32 1, %s1033_s26 }
   0x5   : > { %s176_s9 = ssub.s32 %s1037_s27, %s1108_s30  ;;  %p189_p0 = scmp.ne.s32.totalorder %s1033_s26, %s1029_s25 }
   0x6   : > { %p177_p1 = scmp.eq.s32.totalorder %s176_s9, 0  ;;  %p190_p2 = scmp.eq.s32.totalorder %s1104_s28, 1 }
   0x7   : > { %p195_p3 = scmp.ne.s32.totalorder %s1029_s25, %s1025_s24  ;;  %p196_p4 = scmp.eq.s32.totalorder %s809_s29, 1 }
   0x8   : > { %s1119_s10 = scalar_select %p177_p1, %s1033_s26, %s179_s8  }
   0x9   : > { %p1121_p5 = por %p190_p2, %p189_p0  ;;  %p1125_p6 = por %p196_p4, %p195_p3 }
   0xa   : > { %p812_p7 = scmp.ge.s32.totalorder %s1037_s27, 1  ;;  %p241_p8 = scmp.lt.s32.totalorder %s1037_s27, 3 }
   0xc   : > { %p242_p9 = pnand %p812_p7, %p241_p8 }
   0xd   : > { %v290_v0 = vld [vmem:[%s1325_s1] sm:$0xf] (!%p242_p9)  ;;  %vm339_vm0 = vcmask (!%p242_p9), 1043456   ;;  %s273_s15 = smul.u32 (!%p242_p9), 10, %s1104_s28  ;;  %v1039_v1 = vmov (!%p242_p9), 0.0   ;;  %vm1040_vm1 = vmmov (!%p242_p9), 0  }
   0xe   : > { %245 = sbr.rel (%p242_p9) target bundleno = 728 (0x2d8), region = 48  ;;  %866 = vmatprep.subr.bf16.mxu0 (!%p242_p9), %v1039_v1  ;;  %v341_v2 = vsel (!%p242_p9), %vm339_vm0, %v290_v0, 0  ;;  %868 = vmatprep.mubr.msk.bf16.mxu0 (!%p242_p9), %vm1040_vm1, %v1039_v1  ;;  %vm323_vm2 = vcmask (!%p242_p9), 64512   ;;  %v961_v4 = vld [vmem:[%s1327_s3] sm:$0xff] (!%p242_p9)   ;;  %v962_v6 = vld [vmem:[%s1327_s3 + $0x8] sm:$0xff] (!%p242_p9)   ;;  %vm454_vm3 = vcmask (!%p242_p9), 261120  }
   0xf   : > { %867 = vmatpush3.bf16.msra.mxu0 (!%p242_p9), %v341_v2  ;;  %p274_p10 = scmp.lt.s32.totalorder (!%p242_p9), %s273_s15, 19  ;;  %912 = vmatprep.subr.bf16.mxu1 (!%p242_p9), %v1039_v1  ;;  %v963_v10 = vld [vmem:[%s1329_s5] ss:$8 sps:$4 sm:$0xff] (!%p242_p9)   ;;  %v965_v11 = vld [vmem:[%s1329_s5 + $0x4] ss:$8 sps:$4 sm:$0xff] (!%p242_p9)   ;;  %v1041_v0 = vmov (!%p242_p9), 0  }
  0x10   : > { %913 = vmatpush3.bf16.msra.mxu1 (!%p242_p9), %v341_v2  ;;  %876 = vmatprep.mubr.msk.bf16.mxu1 (!%p242_p9), %vm1040_vm1, %v1039_v1  ;;  %v968_v12 = vld [vmem:[%s1329_s5 + $0x14] ss:$8 sps:$4 sm:$0xff] (!%p242_p9)   ;;  %v966_v13 = vld [vmem:[%s1329_s5 + $0x10] ss:$8 sps:$4 sm:$0xff] (!%p242_p9)   ;;  %v971_v14 = vld [vmem:[%s1329_s5 + $0x24] ss:$8 sps:$4 sm:$0xff] (!%p242_p9)  }
  0x11   : > { %888 = vmatprep.subr.bf16.mxu1 (!%p242_p9), %v1039_v1  ;;  %632 = vmatprep.subr.bf16.mxu0 (!%p242_p9), %v965_v11  ;;  %v969_v15 = vld [vmem:[%s1329_s5 + $0x20] ss:$8 sps:$4 sm:$0xff] (!%p242_p9)   ;;  %v974_v62 = vld [vmem:[%s1329_s5 + $0x34] ss:$8 sps:$4 sm:$0xff] (!%p242_p9)   ;;  %v972_v63 = vld [vmem:[%s1329_s5 + $0x30] ss:$8 sps:$4 sm:$0xff] (!%p242_p9)  }
  0x12   : > { %v815_v16 = vld [vmem:[%s1326_s2] ss:$0 sm:$0xff] (!%p242_p9)  ;;  %vm616_vm4 = vcmask (!%p242_p9), 523264   ;;  %s270_s20 = sand.u32 (!%p242_p9), 1, %s1029_s25   ;;  %s1042_s29 = smov (!%p242_p9), [#allocation2]  }
  0x13   : > { %v826_v2 = vld [vmem:[%s1328_s4] ss:$0 sm:$0xff] (!%p242_p9)  ;;  %s813_s21 = sshll.u32 (!%p242_p9), %s270_s20, 4  ;;  %s979_s8 = sshll.u32 (!%p242_p9), %s1042_s29, 4  ;;  %s980_s8 = int_to_ptr.vmem [resolvable:$false] %s979_s8 }
  0x14   : > { %s272_s17 = scalar_lea.vmem (!%p242_p9), [#allocation2], %s813_s21  ;;  %s981_s9 = scalar_lea.vmem (!%p242_p9), %s980_s8, 512 }
  0x15   : > { %s1339_s15 = smov (!%p274_p10, %s273_s15), 19  ;;  %s750_s18 = sshll.u32 %s272_s17, 4  ;;  %s1282_s18 = int_to_ptr.vmem [resolvable:$true] %s750_s18 }
  0x16   : > { %s814_s16 = sshll.u32 %s1339_s15, 2  ;;  %s975_s21 = scalar_lea.vmem %s1282_s18, 256 }
  0x17   : > { %s277_s19 = scalar_lea.vmem %s1324_s0, %s814_s16  ;;  %s852_s16 = sshll.u32 %s1104_s28, 8 }
  0x18   : > { %v956_v3 = vld [vmem:[%s277_s19] sm:$0xff]   ;;  %v958_v5 = vld [vmem:[%s277_s19 + $0x10] sm:$0xff]   ;;  %v957_v7 = vld [vmem:[%s277_s19 + $0x8] sm:$0xff]   ;;  %s1280_s23 = scalar_lea.hbm %s1331_s7, %s852_s16  ;;  %s736_s28 = scalar_lea.sflag [#allocation3], %s270_s20 }
  0x19   : > { %869 = vmatmul.mubr.msk.bf16.vlgmr.msra.gmra.mrb[0].mxu0 %vm323_vm2, %v956_v3  ;;  %877 = vmatmul.mubr.msk.bf16.vlgmr.msra.gmra.mrb[0].mxu1 %vm323_vm2, %v958_v5  ;;  %v959_v8 = vld [vmem:[%s277_s19 + $0x18] sm:$0xff]   ;;  %v960_v9 = vld [vmem:[%s277_s19 + $0x20] sm:$0xff]   ;;  %p976_p11 = scmp.ne.s32.totalorder %s1282_s18, %s975_s21  ;;  %p982_p0 = scmp.lt.s32.totalorder %s1282_s18, %s980_s8 }
  0x1a   : > { %872 = vmatprep.mubr.msk.bf16.mxu0 %vm1040_vm1, %v1039_v1  ;;  %880 = vmatprep.mubr.msk.bf16.mxu1 %vm1040_vm1, %v1039_v1  ;;  %p983_p1 = scmp.lt.s32.totalorder %s981_s9, %s975_s21 }
  0x1b   : > { %889 = vmatpush3.bf16.msra.mxu1 %v961_v4  ;;  %633 = vmatpush1.bf16.msra.mxu0 %v963_v10  ;;  %p977_p12 = pnand %p976_p11, %p1121_p5 }
  0x1c   : > { %890 = vmatprep.subr.bf16.mxu1 %v1039_v1  ;;  %634 = vmatprep.subr.bf16.mxu0 %v968_v12  ;;  %p984_p2 = por %p983_p1, %p982_p0 }
  0x1d   : > { %p978_p13 = pneg %p977_p12 }
  0x1f   : > { %891 = vmatpush3.bf16.msra.mxu1 %v962_v6  ;;  %635 = vmatpush1.bf16.msra.mxu0 %v966_v13  ;;  %p985_p3 = pnand %p984_p2, %p978_p13 }
  0x20   : > { %636 = vmatprep.subr.bf16.mxu0 %v971_v14 }
  0x21   : > { %873 = vmatmul.mubr.msk.bf16.gmra.mrb[4].mxu0 %vm323_vm2, %v957_v7  ;;  %881 = vmatmul.mubr.msk.bf16.gmra.mrb[4].mxu1 %vm323_vm2, %v959_v8 }
  0x22   : > { %884 = vmatprep.mubr.msk.bf16.mxu1 %vm1040_vm1, %v1039_v1  ;;  %664 = vmatprep.mubr.bf16.mxu0 %v1041_v0 }
  0x23   : > { %637 = vmatpush1.bf16.msra.mxu0 %v969_v15 }
  0x24   : > { %638 = vmatprep.subr.bf16.mxu0 %v974_v62 }
  0x27   : > { %639 = vmatpush1.bf16.msra.mxu0 %v972_v63 }
  0x29   : > { %885 = vmatmul.mubr.msk.bf16.gmra.mrb[8].mxu1 %vm323_vm2, %v960_v9 }
  0x2a   : > { %892 = vmatprep.mubr.msk.bf16.mxu1 %vm1040_vm1, %v1039_v1 }
  0xec   : > { %v377_v17 = vpop.f32.mrb[0].mxu0  ;;  %v393_v21 = vpop.f32.mrb[0].mxu1 }
  0xed   : > { %v378_v18 = vadd.f32 %v815_v16, %v377_v17  ;;  %v870_v19 = vpop.f32.mrb[1].mxu0  ;;  %v394_v24 = vadd.f32 %v815_v16, %v393_v21  ;;  %v878_v25 = vpop.f32.mrb[1].mxu1 }
  0xee   : > { %v380_v20 = vpop.f32.mrb[2].mxu0  ;;  %v396_v26 = vpop.f32.mrb[2].mxu1 }
  0xef   : > { %v381_v22 = vadd.f32 %v815_v16, %v380_v20  ;;  %v871_v23 = vpop.f32.mrb[3].mxu0  ;;  %v416_v27 = vmax.f32 %v378_v18, 0.0  ;;  %v420_v29 = vmax.f32 %v394_v24, 0.0  ;;  %v397_v30 = vadd.f32 %v815_v16, %v396_v26  ;;  %v879_v31 = vpop.f32.mrb[3].mxu1 }
  0xf1   : > { %v417_v28 = vmax.f32 %v381_v22, 0.0  ;;  %v421_v33 = vmax.f32 %v397_v30, 0.0 }
  0xf3   : > { %v426_v32 = vpack.c.bf16 %v417_v28, %v416_v27  ;;  %v428_v37 = vpack.c.bf16 %v421_v33, %v420_v29 }
  0xf4   : > { %v385_v34 = vpop.f32.mrb[4].mxu0  ;;  %v401_v39 = vpop.f32.mrb[4].mxu1 }
  0xf5   : > { %v386_v35 = vadd.f32 %v815_v16, %v385_v34  ;;  %v874_v36 = vpop.f32.mrb[5].mxu0  ;;  %893 = vmatmul.mubr.msk.bf16.vlgmr.msra.gmra.mrb[12].mxu1 %vm454_vm3, %v426_v32  ;;  %v402_v42 = vadd.f32 %v815_v16, %v401_v39  ;;  %v882_v43 = vpop.f32.mrb[5].mxu1  ;;  %v558_v39 = vld [vmem:[%s1330_s6 + $0x10] sm:$0xff] }
  0xf6   : > { %v388_v38 = vpop.f32.mrb[6].mxu0  ;;  %896 = vmatprep.mubr.msk.bf16.mxu1 %vm1040_vm1, %v1039_v1  ;;  %v404_v44 = vpop.f32.mrb[6].mxu1 }
  0xf7   : > { %v389_v40 = vadd.f32 %v815_v16, %v388_v38  ;;  %v875_v41 = vpop.f32.mrb[7].mxu0  ;;  %v418_v45 = vmax.f32 %v386_v35, 0.0  ;;  %v422_v47 = vmax.f32 %v402_v42, 0.0  ;;  %v405_v48 = vadd.f32 %v815_v16, %v404_v44  ;;  %v883_v49 = vpop.f32.mrb[7].mxu1  ;;  %v559_v42 = vld [vmem:[%s1330_s6 + $0x18] sm:$0xff] }
  0xf9   : > { %v419_v46 = vmax.f32 %v389_v40, 0.0  ;;  %v423_v51 = vmax.f32 %v405_v48, 0.0  ;;  %v557_v40 = vld [vmem:[%s1330_s6 + $0x8] sm:$0xff] }
  0xfb   : > { %v427_v50 = vpack.c.bf16 %v419_v46, %v418_v45  ;;  %v429_v52 = vpack.c.bf16 %v423_v51, %v422_v47  ;;  %v560_v51 = vld [vmem:[%s1330_s6 + $0x20] sm:$0xff] }
  0xfc   : > { %v409_v53 = vpop.f32.mrb[8].mxu1 }
  0xfd   : > { %897 = vmatmul.mubr.msk.bf16.gmra.mrb[16].mxu1 %vm454_vm3, %v427_v50  ;;  %v410_v54 = vadd.f32 %v815_v16, %v409_v53  ;;  %v886_v55 = vpop.f32.mrb[9].mxu1 }
  0xfe   : > { %900 = vmatprep.mubr.msk.bf16.mxu1 %vm1040_vm1, %v1039_v1  ;;  %v412_v56 = vpop.f32.mrb[10].mxu1 }
  0xff   : > { %v424_v57 = vmax.f32 %v410_v54, 0.0  ;;  %v413_v58 = vadd.f32 %v815_v16, %v412_v56  ;;  %v887_v59 = vpop.f32.mrb[11].mxu1  ;;  %v562_v54 = vld [vmem:[%s1330_s6 + $0x30] sm:$0xff] }
 0x101   : > { %v425_v60 = vmax.f32 %v413_v58, 0.0 }
 0x103   : > { %v430_v61 = vpack.c.bf16 %v425_v60, %v424_v57  ;;  %v563_v57 = vld [vmem:[%s1330_s6 + $0x38] sm:$0xff] }
 0x105   : > { %901 = vmatmul.mubr.msk.bf16.gmra.mrb[20].mxu1 %vm454_vm3, %v428_v37  ;;  %v556_v37 = vld [vmem:[%s1330_s6] sm:$0xff] }
 0x106   : > { %904 = vmatprep.mubr.msk.bf16.mxu1 %vm1040_vm1, %v1039_v1 }
 0x10d   : > { %905 = vmatmul.mubr.msk.bf16.gmra.mrb[24].mxu1 %vm454_vm3, %v429_v52  ;;  %v561_v52 = vld [vmem:[%s1330_s6 + $0x28] sm:$0xff] }
 0x10e   : > { %908 = vmatprep.mubr.msk.bf16.mxu1 %vm1040_vm1, %v1039_v1 }
 0x115   : > { %909 = vmatmul.mubr.msk.bf16.gmra.mrb[28].mxu1 %vm454_vm3, %v430_v61 }
 0x1c8   : > { %v504_v3 = vpop.f32.mrb[12].mxu1 }
 0x1c9   : > { %v894_v1 = vpop.f32.mrb[13].mxu1  ;;  %v505_v5 = vadd.f32 %v826_v2, %v504_v3 }
 0x1ca   : > { %v507_v4 = vpop.f32.mrb[14].mxu1  ;;  %v564_v1 = vld [vmem:[%s1330_s6 + $0x40] sm:$0xff] }
 0x1cb   : > { %v508_v6 = vadd.f32 %v826_v2, %v507_v4  ;;  %v895_v7 = vpop.f32.mrb[15].mxu1  ;;  %v565_v4 = vld [vmem:[%s1330_s6 + $0x48] sm:$0xff] }
 0x1cd   : > { %v543_v8 = vpack.c.bf16 %v508_v6, %v505_v5  ;;  %v566_v6 = vld [vmem:[%s1330_s6 + $0x50] sm:$0xff] }
 0x1cf   : > { %842 = vmatmul.mubr.msk.bf16.vlgmr.msra.gmra.mrb[8].mxu0 %vm616_vm4, %v543_v8 }
 0x1d0   : > { %v512_v9 = vpop.f32.mrb[16].mxu1  ;;  %674 = vmatprep.mubr.bf16.mxu0 %v1041_v0 }
 0x1d1   : > { %v898_v10 = vpop.f32.mrb[17].mxu1  ;;  %v513_v12 = vadd.f32 %v826_v2, %v512_v9  ;;  %v567_v9 = vld [vmem:[%s1330_s6 + $0x58] sm:$0xff] }
 0x1d2   : > { %v515_v11 = vpop.f32.mrb[18].mxu1 }
 0x1d3   : > { %v516_v13 = vadd.f32 %v826_v2, %v515_v11  ;;  %v899_v14 = vpop.f32.mrb[19].mxu1 }
 0x1d5   : > { %v544_v15 = vpack.c.bf16 %v516_v13, %v513_v12 }
 0x1d7   : > { %843 = vmatmul.mubr.msk.bf16.gmra.mrb[12].mxu0 %vm616_vm4, %v544_v15 }
 0x1d8   : > { %v520_v16 = vpop.f32.mrb[20].mxu1  ;;  %684 = vmatprep.mubr.bf16.mxu0 %v1041_v0 }
 0x1d9   : > { %v902_v17 = vpop.f32.mrb[21].mxu1  ;;  %v521_v19 = vadd.f32 %v826_v2, %v520_v16 }
 0x1da   : > { %v523_v18 = vpop.f32.mrb[22].mxu1 }
 0x1db   : > { %v524_v20 = vadd.f32 %v826_v2, %v523_v18  ;;  %v903_v21 = vpop.f32.mrb[23].mxu1 }
 0x1dd   : > { %v545_v22 = vpack.c.bf16 %v524_v20, %v521_v19  ;;  %v568_v19 = vld [vmem:[%s1330_s6 + $0x60] sm:$0xff]  ;;  %v569_v20 = vld [vmem:[%s1330_s6 + $0x68] sm:$0xff] }
 0x1df   : > { %844 = vmatmul.mubr.msk.bf16.gmra.mrb[16].mxu0 %vm616_vm4, %v545_v22  ;;  %v570_v22 = vld [vmem:[%s1330_s6 + $0x70] sm:$0xff] }
 0x1e0   : > { %v528_v23 = vpop.f32.mrb[24].mxu1  ;;  %694 = vmatprep.mubr.bf16.mxu0 %v1041_v0 }
 0x1e1   : > { %v906_v24 = vpop.f32.mrb[25].mxu1  ;;  %v529_v26 = vadd.f32 %v826_v2, %v528_v23 }
 0x1e2   : > { %v531_v25 = vpop.f32.mrb[26].mxu1 }
 0x1e3   : > { %v532_v27 = vadd.f32 %v826_v2, %v531_v25  ;;  %v907_v28 = vpop.f32.mrb[27].mxu1  ;;  %v571_v25 = vld [vmem:[%s1330_s6 + $0x78] sm:$0xff] }
 0x1e5   : > { %v546_v29 = vpack.c.bf16 %v532_v27, %v529_v26 }
 0x1e7   : > { %845 = vmatmul.mubr.msk.bf16.gmra.mrb[20].mxu0 %vm616_vm4, %v546_v29 }
 0x1e8   : > { %v536_v30 = vpop.f32.mrb[28].mxu1  ;;  %704 = vmatprep.mubr.bf16.mxu0 %v1041_v0 }
 0x1e9   : > { %v910_v31 = vpop.f32.mrb[29].mxu1  ;;  %v537_v33 = vadd.f32 %v826_v2, %v536_v30 }
 0x1ea   : > { %v539_v32 = vpop.f32.mrb[30].mxu1 }
 0x1eb   : > { %v540_v34 = vadd.f32 %v826_v2, %v539_v32  ;;  %v911_v35 = vpop.f32.mrb[31].mxu1 }
 0x1ec   : > { %v572_v35 = vld [vmem:[%s1330_s6 + $0x80] sm:$0xff] }
 0x1ed   : > { %v547_v36 = vpack.c.bf16 %v540_v34, %v537_v33 }
 0x1ef   : > { %846 = vmatmul.mubr.msk.bf16.gmra.mrb[24].mxu0 %vm616_vm4, %v547_v36  ;;  %v573_v36 = vld [vmem:[%s1330_s6 + $0x88] sm:$0xff] }
 0x2a2   : > { %v666_v38 = vpop.f32.mrb[8].mxu0 }
 0x2a3   : > { %v668_v41 = vpop.f32.mrb[9].mxu0  ;;  %v667_v44 = vadd.f32 %v666_v38, %v556_v37  ;;  %v574_v38 = vld [vmem:[%s1330_s6 + $0x90] sm:$0xff] }
 0x2a4   : > { %v670_v43 = vpop.f32.mrb[10].mxu0  ;;  %v669_v47 = vadd.f32 %v668_v41, %v557_v40  ;;  %v575_v41 = vld [vmem:[%s1330_s6 + $0x98] sm:$0xff] }
 0x2a5   : > { %v671_v45 = vadd.f32 %v670_v43, %v558_v39  ;;  %v672_v46 = vpop.f32.mrb[11].mxu0 }
 0x2a6   : > { %v673_v48 = vadd.f32 %v672_v46, %v559_v42 }
 0x2a7   : > { %v715_v49 = vmax.f32 %v667_v44, %v671_v45 }
 0x2a8   : > { %v716_v50 = vmax.f32 %v669_v47, %v673_v48 }
 0x2aa   : > { %v676_v53 = vpop.f32.mrb[12].mxu0 }
 0x2ab   : > { %v677_v55 = vadd.f32 %v676_v53, %v560_v51  ;;  %v678_v56 = vpop.f32.mrb[13].mxu0 }
 0x2ac   : > { %v679_v58 = vadd.f32 %v678_v56, %v561_v52  ;;  %v680_v59 = vpop.f32.mrb[14].mxu0 }
 0x2ad   : > { %v717_v60 = vmax.f32 %v715_v49, %v677_v55  ;;  %v681_v61 = vadd.f32 %v680_v59, %v562_v54  ;;  %v682_v62 = vpop.f32.mrb[15].mxu0 }
 0x2ae   : > { %v718_v63 = vmax.f32 %v716_v50, %v679_v58  ;;  %v683_v0 = vadd.f32 %v682_v62, %v563_v57 }
 0x2af   : > { %v719_v2 = vmax.f32 %v717_v60, %v681_v61 }
 0x2b0   : > { %v720_v3 = vmax.f32 %v718_v63, %v683_v0 }
 0x2b2   : > { %v686_v5 = vpop.f32.mrb[16].mxu0 }
 0x2b3   : > { %v687_v7 = vadd.f32 %v686_v5, %v564_v1  ;;  %v688_v8 = vpop.f32.mrb[17].mxu0 }
 0x2b4   : > { %v689_v10 = vadd.f32 %v688_v8, %v565_v4  ;;  %v690_v11 = vpop.f32.mrb[18].mxu0 }
 0x2b5   : > { %v721_v12 = vmax.f32 %v719_v2, %v687_v7  ;;  %v691_v13 = vadd.f32 %v690_v11, %v566_v6  ;;  %v692_v14 = vpop.f32.mrb[19].mxu0 }
 0x2b6   : > { %v722_v15 = vmax.f32 %v720_v3, %v689_v10  ;;  %v693_v16 = vadd.f32 %v692_v14, %v567_v9 }
 0x2b7   : > { %v723_v17 = vmax.f32 %v721_v12, %v691_v13 }
 0x2b8   : > { %v724_v18 = vmax.f32 %v722_v15, %v693_v16 }
 0x2ba   : > { %v696_v21 = vpop.f32.mrb[20].mxu0 }
 0x2bb   : > { %v697_v23 = vadd.f32 %v696_v21, %v568_v19  ;;  %v698_v24 = vpop.f32.mrb[21].mxu0 }
 0x2bc   : > { %v699_v26 = vadd.f32 %v698_v24, %v569_v20  ;;  %v700_v27 = vpop.f32.mrb[22].mxu0 }
 0x2bd   : > { %v725_v28 = vmax.f32 %v723_v17, %v697_v23  ;;  %v701_v29 = vadd.f32 %v700_v27, %v570_v22  ;;  %v702_v30 = vpop.f32.mrb[23].mxu0 }
 0x2be   : > { %v726_v31 = vmax.f32 %v724_v18, %v699_v26  ;;  %v703_v32 = vadd.f32 %v702_v30, %v571_v25 }
 0x2bf   : > { %v727_v33 = vmax.f32 %v725_v28, %v701_v29 }
 0x2c0   : > { %v728_v34 = vmax.f32 %v726_v31, %v703_v32 }
 0x2c2   : > { %v706_v37 = vpop.f32.mrb[24].mxu0 }
 0x2c3   : > { %v707_v39 = vadd.f32 %v706_v37, %v572_v35  ;;  %v708_v40 = vpop.f32.mrb[25].mxu0 }
 0x2c4   : > { %v709_v42 = vadd.f32 %v708_v40, %v573_v36  ;;  %v710_v43 = vpop.f32.mrb[26].mxu0 }
 0x2c5   : > { %v729_v44 = vmax.f32 %v727_v33, %v707_v39  ;;  %v711_v45 = vadd.f32 %v710_v43, %v574_v38  ;;  %v712_v46 = vpop.f32.mrb[27].mxu0 }
 0x2c6   : > { %v730_v47 = vmax.f32 %v728_v34, %v709_v42  ;;  %v713_v48 = vadd.f32 %v712_v46, %v575_v41 }
 0x2c7   : > { %v731_v49 = vmax.f32 %v729_v44, %v711_v45 }
 0x2c8   : > { %v732_v50 = vmax.f32 %v730_v47, %v713_v48 }
 0x2c9   : > { %733 = vst [vmem:[%s272_s17] sm:$0xff] %v731_v49 }
 0x2ca   : > { %734 = vst [vmem:[%s272_s17 + $0x8] sm:$0xff] %v732_v50 }
 0x2cb   : > { %988 = shalt.err (!%p985_p3)
}
 0x2cc   : > { %s989_s20 = scalar_lea.hbm %s1280_s23, 256  ;;  %s993_s15 = scalar_lea.hbm %s1331_s7, 512 }
 0x2cd   : > { %p990_p4 = scmp.ne.s32.totalorder %s1280_s23, %s989_s20  ;;  %p994_p9 = scmp.lt.u32.totalorder %s1280_s23, %s1331_s7 }
 0x2ce   : > { %p995_p10 = scmp.lt.u32.totalorder %s993_s15, %s989_s20  ;;  %p997_p12 = scmp.lt.u32.totalorder %s989_s20, %s1280_s23 }
 0x2cf   : > { %p991_p7 = pnand %p990_p4, %p1121_p5 }
 0x2d0   : > { %p996_p11 = por %p995_p10, %p994_p9 }
 0x2d1   : > { %p992_p8 = pneg %p991_p7 }
 0x2d2   : > { %p998_p13 = por %p997_p12, %p996_p11 }
 0x2d4   : > { %p999_p0 = pnand %p998_p13, %p992_p8 }
 0x2d6   : > { %1002 = shalt.err (!%p999_p0)
}
 0x2d7   : > { %914 = dma.vmem_to_hbm [thread:$0]  (%p1121_p5), %s1282_s18, 256, %s1280_s23, %s736_s28  }
 0x2d8 PF: > { %p920_p1 = scmp.ge.s32.totalorder %s1037_s27, 2  ;;  %s762_s19 = sand.u32 1, %s1025_s24  }
 0x2d9   : > { %s763_s22 = scalar_lea.sflag [#allocation3], %s762_s19 }
 0x2da   : > { %p917_p2 = pnand %p920_p1, %p1125_p6 }
 0x2dc   : > { %1020 = dma.done.wait (!%p917_p2), %s763_s22, 256  }
 0x2dd   : > { %1022 = vsyncadd (!%p917_p2), %s763_s22, 4294967040  ;;  %p17_p3 = scmp.ge.s32.totalorder %s1108_s30, 4   ;;  %s1334_s24 = smov %s1029_s25 }
 0x2de   : > { %s1335_s25 = smov %s1033_s26  ;;  %s1336_s26 = smov %s1119_s10 }
 0x2df   : > { %s1337_s27 = smov %s1108_s30  ;;  %19 = sbr.rel (!%p17_p3) target bundleno = 3 (0x3), region = 83 }
 0x2e6   :  { %768 = vsyncpa [#allocation3], 1 }
 0x2e7   :  { %770 = vsyncpa [#allocation3 + $0x1], 1 }

</bundles_post_ra>
